<compile_context>
chip_gen: v5e
topology: v5e:2x2
jax: 0.10.0
libtpu: 0.0.40
codegen_flags: <defaults>
</compile_context>

<pallas_src>
import jax
import jax.numpy as jnp
from jax.experimental import pallas as pl
from jax.experimental.pallas import tpu as pltpu


def patch_embed_kernel(patches_ref, w_ref, addend_ref, out_ref):
    # patches_ref: (BB, Tp, Kp)  BB images' patch rows (row 0 = zero cls slot)
    # w_ref:       (Kp, Ep)      resident projection weight (bf16)
    # addend_ref:  (Tp, Ep)      resident f32 addend (pos_emb + bias, cls folded)
    # out_ref:     (BB, Tp, Ep)  tokens for these BB images
    bb, tp, kp = patches_ref.shape
    ep = w_ref.shape[1]
    # Collapse the image axis into M: Tp % 8 == 0 and Kp % 128 == 0, so this
    # reshape is a pure retiling (no data movement) and feeds the MXU one big
    # (BB*Tp, Kp) @ (Kp, Ep) matmul instead of BB small ones.
    acc = jnp.dot(patches_ref[...].reshape(bb * tp, kp), w_ref[...],
                  preferred_element_type=jnp.float32)
    acc = acc.reshape(bb, tp, ep) + addend_ref[...]      # broadcast over BB
    out_ref[...] = acc.astype(out_ref.dtype)


def _round_up(x, m):
    return (x + m - 1) // m * m


def _pick_images_per_step(batch, tp, kp, ep, out_itemsize,
                          max_bb=8, vmem_budget=40 * 1024 * 1024):
    """Largest divisor of `batch` <= max_bb that fits the VMEM budget and
    (when batch >= 2) keeps the grid length >= 2 so both v7x cores get work."""
    best = 1
    for bb in range(1, min(batch, max_bb) + 1):
        if batch % bb:
            continue
        if batch >= 2 and batch // bb < 2:
            continue
        per_step = (2 * bb * tp * kp * 2                 # bf16 patches, 2 buffers
                    + 2 * bb * tp * ep * out_itemsize)   # output, 2 buffers
        if per_step > vmem_budget:
            continue
        best = bb
    return best


def conv_patch_embedding(x, conv_w, conv_b, cls_tok, pos_emb, patch_size, *,
                         compute_dtype=jnp.bfloat16, out_dtype=None):
    """Forward pass of ConvPatchEmbedding.

    x:       (B, C, H, W)   NCHW, like the PyTorch module
    conv_w:  (E, C, P, P)   Conv2d weight (OIHW)
    conv_b:  (E,)           Conv2d bias
    cls_tok: (1, 1, E)      class token
    pos_emb: (1, N+1, E)    positional embedding
    returns: (B, N+1, E) in `out_dtype` (defaults to compute_dtype, i.e. bf16)
    """
    if out_dtype is None:
        out_dtype = compute_dtype
    B, C, H, W = x.shape
    P = patch_size
    Hp, Wp = H // P, W // P
    N = Hp * Wp
    E = conv_w.shape[0]
    K = C * P * P
    T = N + 1                        # tokens per image (cls + patches)
    Tp = _round_up(T, 8)             # sublane-aligned token rows (unmasked vst)
    Kp = _round_up(K, 128)           # lane-dense contraction dim for the MXU
    Ep = _round_up(E, 128)           # lane-dense output dim
    out_itemsize = jnp.dtype(out_dtype).itemsize

    BB = _pick_images_per_step(B, Tp, Kp, Ep, out_itemsize)
    grid_len = B // BB

    # --- host-side rearrange: NCHW image -> per-image patch matrix ---------
    # TODO(synk): fusing this rearrange into the kernel (grid over (B, Hp),
    # in-kernel (C,P,Wp,P)->(Wp, C*P*P) shuffle on the XLU) would remove the
    # bf16 patches intermediate (~30-40% of HBM traffic); kept host-side.
    patches = (x.reshape(B, C, Hp, P, Wp, P)
                 .transpose(0, 2, 4, 1, 3, 5)            # (B, Hp, Wp, C, P, P)
                 .reshape(B, N, K)
                 .astype(compute_dtype))
    # Prepend one zero "patch" row per image (the cls-token slot), pad rows to
    # Tp and lanes to Kp.  Zero rows @ W == 0, so the addend alone produces the
    # cls row and the padded rows stay exactly zero.
    patches = jnp.pad(patches, ((0, 0), (1, Tp - T), (0, Kp - K)))   # (B, Tp, Kp)

    # Conv2d OIHW weight flattened over (C, P, P) == per-patch linear weight.
    w_mat = conv_w.reshape(E, K).T.astype(compute_dtype)             # (K, E)
    w_mat = jnp.pad(w_mat, ((0, Kp - K), (0, Ep - E)))               # (Kp, Ep)

    # Fold conv bias + positional embedding + cls token into one f32 addend.
    addend = pos_emb[0].astype(jnp.float32)                          # (T, E)
    addend = addend.at[0].add(cls_tok[0, 0].astype(jnp.float32))     # cls + pos[0]
    addend = addend.at[1:].add(conv_b.astype(jnp.float32))           # + conv bias
    addend = jnp.pad(addend, ((0, Tp - T), (0, Ep - E)))             # (Tp, Ep)

    bytes_accessed = (patches.size * patches.dtype.itemsize
                      + w_mat.size * w_mat.dtype.itemsize
                      + addend.size * addend.dtype.itemsize
                      + B * Tp * Ep * out_itemsize)
    cost = pl.CostEstimate(flops=2 * B * Tp * Kp * Ep,
                           transcendentals=0,
                           bytes_accessed=bytes_accessed)

    # VMEM: double-buffered patch + output blocks, single-buffered residents.
    vmem_needed = (2 * BB * Tp * Kp * patches.dtype.itemsize
                   + 2 * BB * Tp * Ep * out_itemsize
                   + Kp * Ep * w_mat.dtype.itemsize
                   + Tp * Ep * 4)
    vmem_limit = int(min(max(32 * 1024 * 1024, vmem_needed * 5 // 4),
                         64 * 1024 * 1024))

    out = pl.pallas_call(
        patch_embed_kernel,
        out_shape=jax.ShapeDtypeStruct((B, Tp, Ep), out_dtype),
        grid=(grid_len,),
        in_specs=[
            pl.BlockSpec((BB, Tp, Kp), lambda b: (b, 0, 0)),     # BB images/step
            pl.BlockSpec((Kp, Ep), lambda b: (0, 0),
                         pipeline_mode=pl.Buffered(1)),          # resident weight
            pl.BlockSpec((Tp, Ep), lambda b: (0, 0),
                         pipeline_mode=pl.Buffered(1)),          # resident addend
        ],
        out_specs=pl.BlockSpec((BB, Tp, Ep), lambda b: (b, 0, 0)),
        compiler_params=pltpu.CompilerParams(
            dimension_semantics=("parallel",),
            vmem_limit_bytes=vmem_limit),
        cost_estimate=cost,
    )(patches, w_mat, addend)

    if Tp != T or Ep != E:
        # Padded rows/lanes are exactly zero; slice them off.  (If E % 128 != 0
        # this re-materializes the output once in HBM -- perf, not correctness.)
        out = out[:, :T, :E]
    return out                       # (B, N+1, E)


def _reference(x, conv_w, conv_b, cls_tok, pos_emb, patch_size):
    """Pure-JAX f32 reference mirroring the PyTorch forward."""
    out = jax.lax.conv_general_dilated(
        x, conv_w, window_strides=(patch_size, patch_size), padding="VALID",
        dimension_numbers=("NCHW", "OIHW", "NCHW"))
    out = out + conv_b[None, :, None, None]
    B, E, Hp, Wp = out.shape
    out = out.reshape(B, E, Hp * Wp).transpose(0, 2, 1)              # (B, N, E)
    cls_row = jnp.broadcast_to(cls_tok, (B, 1, E))
    out = jnp.concatenate([cls_row, out], axis=1)
    return out + pos_emb


if __name__ == "__main__":
    # Small, forward-consistent shapes: image=16, patch=4, C=4, E=32, B=2
    image_size, patch_size = 16, 4
    in_channels, embedding_dim = 4, 32
    batch = 2
    num_patches = image_size ** 2 // patch_size ** 2     # 16

    key = jax.random.PRNGKey(0)
    kx, kw, kb, kc, kp = jax.random.split(key, 5)
    x = jax.random.normal(kx, (batch, in_channels, image_size, image_size),
                          dtype=jnp.float32)
    conv_w = jax.random.normal(
        kw, (embedding_dim, in_channels, patch_size, patch_size),
        dtype=jnp.float32) * 0.05
    conv_b = jax.random.normal(kb, (embedding_dim,), dtype=jnp.float32) * 0.05
    cls_tok = jax.random.normal(kc, (1, 1, embedding_dim), dtype=jnp.float32)
    pos_emb = jax.random.normal(kp, (1, num_patches + 1, embedding_dim),
                                dtype=jnp.float32)

    out = conv_patch_embedding(x, conv_w, conv_b, cls_tok, pos_emb, patch_size)
    out = jax.block_until_ready(out)

    ref = _reference(x, conv_w, conv_b, cls_tok, pos_emb, patch_size)
    assert out.shape == (batch, num_patches + 1, embedding_dim), out.shape
    # bf16 inputs + bf16 output (f32 MXU accumulation) vs f32 reference.
    assert jnp.allclose(out.astype(jnp.float32), ref, atol=5e-2, rtol=5e-2), \
        "mismatch vs reference"

    print("KERNEL_OK")
</pallas_src>

<mosaic_0001>
module attributes {stable_mosaic.version = 11 : i64} {
  func.func @patch_embed_kernel(%arg0: i32, %arg1: memref<1x24x128xbf16, #tpu.memory_space<vmem>>, %arg2: memref<128x128xbf16, #tpu.memory_space<vmem>>, %arg3: memref<24x128xf32, #tpu.memory_space<vmem>>, %arg4: memref<1x24x128xbf16, #tpu.memory_space<vmem>>) attributes {dimension_semantics = [#tpu.dimension_semantics<parallel>], iteration_bounds = array<i64: 2>, scalar_prefetch = 0 : i64, scratch_operands = 0 : i64, tpu.core_type = #tpu.core_type<tc>, window_params = [{transform_indices = @transform_0, window_bounds = array<i64: 1, 24, 128>}, {pipeline_mode = #tpu.pipeline_mode<synchronous>, transform_indices = @transform_1, window_bounds = array<i64: 128, 128>}, {pipeline_mode = #tpu.pipeline_mode<synchronous>, transform_indices = @transform_2, window_bounds = array<i64: 24, 128>}, {transform_indices = @transform_3, window_bounds = array<i64: 1, 24, 128>}]} {
    %c0 = arith.constant 0 : index
    %c0_0 = arith.constant 0 : index
    %c0_1 = arith.constant 0 : index
    %0 = vector.load %arg1[%c0, %c0_0, %c0_1] : memref<1x24x128xbf16, #tpu.memory_space<vmem>>, vector<1x24x128xbf16>
    %1 = vector.shape_cast %0 : vector<1x24x128xbf16> to vector<24x128xbf16>
    %c0_2 = arith.constant 0 : index
    %c0_3 = arith.constant 0 : index
    %2 = vector.load %arg2[%c0_2, %c0_3] : memref<128x128xbf16, #tpu.memory_space<vmem>>, vector<128x128xbf16>
    %cst = arith.constant dense<0.000000e+00> : vector<24x128xf32>
    %3 = tpu.matmul %1, %2, %cst {dimension_numbers = #tpu.dot_dimension_numbers<[1], [0], [0], [1], [0, 0, 1, 1], [], []>} : vector<24x128xbf16>, vector<128x128xbf16>, vector<24x128xf32> -> vector<24x128xf32>
    %4 = vector.shape_cast %3 : vector<24x128xf32> to vector<1x24x128xf32>
    %c0_4 = arith.constant 0 : index
    %c0_5 = arith.constant 0 : index
    %5 = vector.load %arg3[%c0_4, %c0_5] : memref<24x128xf32, #tpu.memory_space<vmem>>, vector<24x128xf32>
    %6 = vector.shape_cast %5 : vector<24x128xf32> to vector<1x24x128xf32>
    %7 = arith.addf %4, %6 : vector<1x24x128xf32>
    %8 = arith.truncf %7 : vector<1x24x128xf32> to vector<1x24x128xbf16>
    %c0_6 = arith.constant 0 : index
    %c0_7 = arith.constant 0 : index
    %c0_8 = arith.constant 0 : index
    %9 = vector.load %arg4[%c0_6, %c0_7, %c0_8] : memref<1x24x128xbf16, #tpu.memory_space<vmem>>, vector<1x24x128xbf16>
    tpu.vector_store %arg4[%c0_6, %c0_7, %c0_8], %8 {strides = array<i32>} : memref<1x24x128xbf16, #tpu.memory_space<vmem>>, vector<1x24x128xbf16>,
    return
  }
  func.func @transform_0(%arg0: i32) -> (i32, i32, i32) {
    %c0_i32 = arith.constant 0 : i32
    %c0_i32_0 = arith.constant 0 : i32
    %c0_i32_1 = arith.constant 0 : i32
    return %arg0, %c0_i32, %c0_i32_0 : i32, i32, i32
  }
  func.func @transform_1(%arg0: i32) -> (i32, i32) {
    %c0_i32 = arith.constant 0 : i32
    %c0_i32_0 = arith.constant 0 : i32
    %c0_i32_1 = arith.constant 0 : i32
    return %c0_i32, %c0_i32_0 : i32, i32
  }
  func.func @transform_2(%arg0: i32) -> (i32, i32) {
    %c0_i32 = arith.constant 0 : i32
    %c0_i32_0 = arith.constant 0 : i32
    %c0_i32_1 = arith.constant 0 : i32
    return %c0_i32, %c0_i32_0 : i32, i32
  }
  func.func @transform_3(%arg0: i32) -> (i32, i32, i32) {
    %c0_i32 = arith.constant 0 : i32
    %c0_i32_0 = arith.constant 0 : i32
    %c0_i32_1 = arith.constant 0 : i32
    return %arg0, %c0_i32, %c0_i32_0 : i32, i32, i32
  }
}

</mosaic_0001>

<bundles_post_ra>
// kernel: tpu_custom_call.1
= control target key start
LH: loop header
LB: loop body
LE: loop exit
PB: predicated region body
PF: predicated region fallthrough
CT: control target
= control target key end

     0   :  { %8 = vsyncpa [#allocation3], 0  ;;  %s927_s0 = inlined_call_operand.hbm [shape: bf16[2,24,128], index: 0, kind: input, shape index: {}]   ;;  %s928_s1 = inlined_call_operand.hbm [shape: bf16[128,128], index: 1, kind: input, shape index: {}]   ;;  %s929_s2 = inlined_call_operand.hbm [shape: f32[24,128], index: 2, kind: input, shape index: {}]   ;;  %s930_s3 = inlined_call_operand.hbm [shape: bf16[2,24,128], index: 3, kind: output, shape index: {}]  }
   0x1   :  { %10 = vsyncpa [#allocation3 + $0x1], 0 }
   0x2   :  { %11 = vsyncpa [#allocation6], 0 }
   0x3   :  { %12 = vsyncpa [#allocation4], 0 }
   0x4   :  { %14 = vsyncpa [#allocation4 + $0x1], 0  ;;  %s776_s12 = smov 0   ;;  %s778_s13 = smov 0  }
   0x5   :  { %s780_s14 = smov 0   ;;  %s782_s15 = smov 0  }
   0x6 LB: > { %s797_s16 = sadd.s32 4294967295, %s746_s15   ;;  %s439_s17 = sadd.s32 4294967294, %s746_s15   ;;  %s746_s15 = sphi %s782_s15, %s942_s15   ;;  %s742_s14 = sphi %s780_s14, %s941_s14   ;;  %s738_s13 = sphi %s778_s13, %s940_s13   ;;  %s734_s12 = sphi %s776_s12, %s939_s12  }
   0x7   : > { %p40_p0 = scmp.ne.s32.totalorder %s738_s13, %s734_s12  ;;  %p41_p1 = scmp.eq.s32.totalorder %s797_s16, 0 }
   0x8   : > { %p106_p2 = scmp.eq.s32.totalorder %s797_s16, 1  ;;  %p112_p3 = scmp.eq.s32.totalorder %s439_s17, 1 }
   0x9   : > { %p806_p4 = por %p41_p1, %p40_p0  ;;  %p440_p5 = scmp.ge.s32.totalorder %s746_s15, 1 }
   0xa   : > { %p811_p6 = por %p112_p3, %p40_p0  ;;  %p119_p7 = scmp.lt.s32.totalorder %s746_s15, 3 }
   0xb   : > { %s130_s22 = sshll.u32 %s928_s1, 4  ;;  %s748_s24 = smov [#allocation5]   ;;  %s131_s22 = int_to_ptr.hbm [resolvable:$true] %s130_s22 }
   0xc   : > { %p819_p8 = pnand %p440_p5, %p119_p7  ;;  %s132_s25 = sshll.u32 %s748_s24, 4  ;;  %s133_s25 = int_to_ptr.vmem [resolvable:$true] %s132_s25 }
   0xd   : > { %s144_s28 = sshll.u32 %s929_s2, 4  ;;  %s931_s29 = smov 64   ;;  %s145_s28 = int_to_ptr.hbm [resolvable:$true] %s144_s28 }
   0xe   : > { %p525_p9 = pneg %p819_p8  ;;  %s750_s30 = smov 4  }
   0xf   : > { %s751_s4 = smov [#allocation7]   ;;  %s752_s6 = smov 128  }
  0x10   : > { %p526_p10 = pnand %p525_p9, %p41_p1  ;;  %s146_s5 = sshll.u32 %s751_s4, 4  ;;  %s147_s5 = int_to_ptr.vmem [resolvable:$true] %s146_s5 }
  0x11   : > { %s753_s7 = smov 8   ;;  %s835_s8 = sadd.s32 1, %s746_s15  }
  0x12   : > { %528 = dma.hbm_to_vmem [thread:$0]  (!%p526_p10), %s131_s22, 1024, %s133_s25, [#allocation6], %s931_s29, %s931_s29, %s750_s30  }
  0x13   : > { %531 = dma.hbm_to_vmem [thread:$0]  (!%p526_p10), %s145_s28, 384, %s147_s5, [#allocation6], %s752_s6, %s752_s6, %s753_s7  }
  0x14   : > { %s24_s9 = ssub.s32 %s746_s15, %s835_s8  ;;  %s27_s10 = sadd.s32 1, %s742_s14 }
  0x15   : > { %p25_p12 = scmp.eq.s32.totalorder %s24_s9, 0  ;;  %p34_p13 = scmp.ne.s32.totalorder %s742_s14, %s738_s13 }
  0x16   : > { %p35_p0 = scmp.eq.s32.totalorder %s746_s15, 0  ;;  %p542_p7 = scmp.lt.s32.totalorder %s746_s15, 2 }
  0x17   : > { %s844_s11 = scalar_select %p25_p12, %s742_s14, %s27_s10  }
  0x18   : > { %p36_p3 = por %p35_p0, %p34_p13  ;;  %p848_p5 = por %p106_p2, %p34_p13 }
  0x19   : > { %s160_s20 = sand.u32 1, %s742_s14   ;;  %s510_s22 = smul.u32 12, %s746_s15 }
  0x1a   : > { %s509_s21 = smul.u32 12, %s160_s20  ;;  %p855_p9 = pnand %p542_p7, %p36_p3 }
  0x1b   : > { %s169_s27 = scalar_lea.hbm %s927_s0, %s510_s22  ;;  %s161_s6 = scalar_lea.sflag [#allocation3], %s160_s20 }
  0x1c   : > { %s164_s28 = scalar_lea.vmem [#allocation2], %s509_s21  ;;  %s170_s5 = sshll.u32 %s169_s27, 4  ;;  %s171_s5 = int_to_ptr.hbm [resolvable:$true] %s170_s5 }
  0x1d   : > { %s172_s4 = sshll.u32 %s164_s28, 4  ;;  %s646_s7 = sshra.s32 %s171_s5, 4  ;;  %s173_s4 = int_to_ptr.vmem [resolvable:$true] %s172_s4  ;;  %s647_s7 = int_to_ptr.hbm [resolvable:$true] %s646_s7 }
  0x1e   : > { %s648_s9 = scalar_lea.hbm %s647_s7, 12  ;;  %p650_p10 = pneg %p855_p9 }
  0x1f   : > { %p649_p2 = scmp.ne.s32.totalorder %s647_s7, %s648_s9  ;;  %s653_s25 = scalar_lea.hbm %s927_s0, 24 }
  0x20   : > { %p654_p0 = scmp.lt.s32.totalorder %s647_s7, %s927_s0  ;;  %p655_p3 = scmp.lt.s32.totalorder %s653_s25, %s648_s9 }
  0x21   : > { %p651_p12 = pnand %p650_p10, %p649_p2 }
  0x22   : > { %p656_p7 = por %p655_p3, %p654_p0 }
  0x23   : > { %p652_p13 = pneg %p651_p12 }
  0x25   : > { %p657_p11 = pnand %p656_p7, %p652_p13 }
  0x27   : > { %660 = shalt.err (!%p657_p11)
}
  0x28   : > { %s937_s20 = smov 64   ;;  %184 = sbr.rel (%p819_p8) target bundleno = 223 (0xdf), region = 32 }
  0x29   : > { %535 = dma.hbm_to_vmem [thread:$0]  (!%p855_p9), %s171_s5, 192, %s173_s4, %s161_s6, %s937_s20, %s937_s20, %s750_s30  }
  0x2a   : > { %s878_s29 = sand.u32 (!%p819_p8), 1, %s738_s13  }
  0x2b   : > { %s511_s21 = smul.u32 (!%p819_p8), 12, %s878_s29  ;;  %s187_s27 = scalar_lea.sflag (!%p819_p8), [#allocation3], %s878_s29 }
  0x2d   : > { %s190_s28 = scalar_lea.vmem [#allocation2], %s511_s21 }
  0x2e   : > { %721 = dma.done.wait (%p806_p4), %s187_s27, 192  }
  0x2f   : > { %723 = vsyncadd (%p806_p4), %s187_s27, 4294967104 }
  0x30   : > { %725 = dma.done.wait (%p41_p1), [#allocation6], 1408  }
  0x31   : > { %727 = vsyncadd (%p41_p1), [#allocation6], 4294965888  ;;  %v495_v0 = vld [vmem:[#allocation5 + $0x38] sm:$0xff]  ;;  %v494_v1 = vld [vmem:[#allocation5 + $0x30] sm:$0xff]  ;;  %s512_s18 = smul.u32 12, %s797_s16  ;;  %s223_s4 = scalar_lea.vmem [#allocation8], %s511_s21 }
  0x32   : > { %301 = vmatpush.bf16.msra.mxu0 %v495_v0  ;;  %501 = vmatpush.bf16.msra.mxu1 %v495_v0  ;;  %v493_v2 = vld [vmem:[#allocation5 + $0x28] sm:$0xff]  ;;  %v492_v3 = vld [vmem:[#allocation5 + $0x20] sm:$0xff]  ;;  %v491_v4 = vld [vmem:[#allocation5 + $0x18] sm:$0xff]  ;;  %s344_s5 = sshll.u32 %s223_s4, 4  ;;  %s332_s16 = scalar_lea.sflag [#allocation4], %s878_s29  ;;  %s345_s5 = int_to_ptr.vmem [resolvable:$true] %s344_s5 }
  0x33   : > { %v490_v5 = vld [vmem:[#allocation5 + $0x10] sm:$0xff]  ;;  %v489_v6 = vld [vmem:[#allocation5 + $0x8] sm:$0xff]  ;;  %v488_v9 = vld [vmem:[#allocation5] sm:$0xff]  ;;  %s343_s24 = scalar_lea.hbm %s930_s3, %s512_s18  ;;  %s696_s26 = scalar_lea.hbm %s930_s3, 24 }
  0x34   : > { %v226_v7 = vld [vmem:[%s190_s28 + $0x8] sm:$0xf]  ;;  %v487_v10 = vld [vmem:[%s190_s28] sm:$0xff]  ;;  %v319_v17 = vld [vmem:[#allocation7] sm:$0xff]  ;;  %s346_s6 = sshll.u32 %s343_s24, 4  ;;  %s347_s6 = int_to_ptr.hbm [resolvable:$true] %s346_s6 }
  0x35   : > { %v248_v8 = vunpack.c.l.b16 %v226_v7  ;;  %v321_v12 = vld [vmem:[#allocation7 + $0x10] sm:$0xff]  ;;  %v320_v18 = vld [vmem:[#allocation7 + $0x8] sm:$0xff]  ;;  %s690_s7 = sshra.s32 %s347_s6, 4  ;;  %s691_s7 = int_to_ptr.hbm [resolvable:$true] %s690_s7 }
  0x36   : > { %302 = vmatpush.bf16.msra.mxu0 %v494_v1  ;;  %502 = vmatpush.bf16.msra.mxu1 %v494_v1  ;;  %s692_s9 = scalar_lea.hbm %s691_s7, 12  ;;  %p697_p11 = scmp.lt.s32.totalorder %s691_s7, %s930_s3 }
  0x37   : > { %v250_v11 = vpack.c.b16 %v248_v8, %v248_v8  ;;  %p693_p1 = scmp.ne.s32.totalorder %s691_s7, %s692_s9  ;;  %p698_p9 = scmp.lt.s32.totalorder %s696_s26, %s692_s9 }
  0x39   : > { %p694_p4 = pnand %p693_p1, %p848_p5  ;;  %p699_p2 = por %p698_p9, %p697_p11 }
  0x3a   : > { %303 = vmatpush.bf16.msra.mxu0 %v493_v2  ;;  %503 = vmatpush.bf16.msra.mxu1 %v493_v2 }
  0x3b   : > { %p695_p8 = pneg %p694_p4 }
  0x3d   : > { %p700_p10 = pnand %p699_p2, %p695_p8 }
  0x3e   : > { %304 = vmatpush.bf16.msra.mxu0 %v492_v3  ;;  %504 = vmatpush.bf16.msra.mxu1 %v492_v3 }
  0x42   : > { %305 = vmatpush.bf16.msra.mxu0 %v491_v4  ;;  %505 = vmatpush.bf16.msra.mxu1 %v491_v4 }
  0x46   : > { %306 = vmatpush.bf16.msra.mxu0 %v490_v5  ;;  %506 = vmatpush.bf16.msra.mxu1 %v490_v5 }
  0x4a   : > { %307 = vmatpush.bf16.msra.mxu0 %v489_v6  ;;  %507 = vmatpush.bf16.msra.mxu1 %v489_v6 }
  0x4e   : > { %308 = vmatpush.bf16.msra.mxu0 %v488_v9  ;;  %508 = vmatpush.bf16.msra.mxu1 %v488_v9 }
  0x51   : > { %309 = vmatmul.bf16.vlgmr.msra.gmra.mxu0 %v487_v10  ;;  %314 = vmatmul.bf16.vlgmr.msra.gmra.mxu1 %v250_v11 }
  0xce   : > { %v310_v13 = vpop.f32.mrf.mxu0  ;;  %v315_v14 = vpop.f32.mrf.mxu1 }
  0xcf   : > { %v324_v15 = vadd.f32 %v321_v12, %v315_v14  ;;  %v322_v21 = vadd.f32 %v319_v17, %v310_v13 }
  0xd1   : > { %v327_v16 = vpack.c.bf16 %v324_v15, %v324_v15 }
  0xd3   : > { %330 = vst [vmem:[%s223_s4 + $0x8] sm:$0xf] %v327_v16 }
  0xd6   : > { %v312_v19 = vpop.f32.mrf.mxu0  ;;  %v317_v20 = vpop.f32.mrf.mxu1 }
  0xd7   : > { %v323_v22 = vadd.f32 %v320_v18, %v312_v19 }
  0xd9   : > { %v499_v23 = vpack.c.bf16 %v323_v22, %v322_v21 }
  0xdb   : > { %500 = vst [vmem:[%s223_s4] sm:$0xff] %v499_v23  }
  0xdc   : > { %703 = shalt.err (!%p700_p10)
}
  0xdd   : > { %s754_s29 = smov 64   ;;  %s755_s21 = smov 4  }
  0xde   : > { %523 = dma.vmem_to_hbm [thread:$0]  (%p848_p5), %s345_s5, 192, %s347_s6, %s332_s16, %s754_s29, %s754_s29, %s755_s21  }
  0xdf PF: > { %s361_s27 = sand.u32 1, %s734_s12   ;;  %p938_p12 = scmp.ge.s32.totalorder %s746_s15, 2 }
  0xe0   : > { %s362_s28 = scalar_lea.sflag [#allocation4], %s361_s27 }
  0xe1   : > { %p537_p13 = pnand %p938_p12, %p811_p6 }
  0xe3   : > { %p538_p0 = pneg %p537_p13 }
  0xe5   : > { %729 = dma.done.wait (%p538_p0), %s362_s28, 192  }
  0xe6   : > { %731 = vsyncadd (%p538_p0), %s362_s28, 4294967104  ;;  %p17_p3 = scmp.ge.s32.totalorder %s835_s8, 4   ;;  %s939_s12 = smov %s738_s13 }
  0xe7   : > { %s940_s13 = smov %s742_s14  ;;  %s941_s14 = smov %s844_s11 }
  0xe8   : > { %s942_s15 = smov %s835_s8  ;;  %19 = sbr.rel (!%p17_p3) target bundleno = 6 (0x6), region = 85 }
  0xed   :  { %368 = vsyncpa [#allocation3], 1 }
  0xee   :  { %370 = vsyncpa [#allocation3 + $0x1], 1 }
  0xef   :  { %371 = vsyncpa [#allocation6], 1 }
  0xf0   :  { %372 = vsyncpa [#allocation4], 1 }
  0xf1   :  { %374 = vsyncpa [#allocation4 + $0x1], 1 }

</bundles_post_ra>
